<compile_context>
chip_gen: v5e
topology: v5e:2x2
jax: 0.10.0
libtpu: 0.0.40
codegen_flags: <defaults>
</compile_context>

<pallas_src>
import jax
import jax.numpy as jnp
from jax.experimental import pallas as pl
from jax.experimental.pallas import tpu as pltpu


# ----------------------------------------------------------------------------
# Kernel 0: step-invariant attention keys  e_h = h @ W_h^T + b_a   (bf16 out)
# Depends only on encoder outputs -> computed ONCE per source sequence.
# Row-tiled + "parallel" so it streams/pipelines at production B*L.
# ----------------------------------------------------------------------------
def attn_keys_kernel(h_ref, w_ref, b_ref, out_ref):
    acc = jnp.dot(h_ref[...], w_ref[...], preferred_element_type=jnp.float32)
    out_ref[...] = (acc + b_ref[...]).astype(out_ref.dtype)


def precompute_attention_keys(h_bf, params, *, tile_r=512):
    B, L, H2 = h_bf.shape
    H = params["wa_h_t"].shape[1]
    R = B * L
    tile_r = min(tile_r, R)
    assert R % tile_r == 0

    eh2d = pl.pallas_call(
        attn_keys_kernel,
        out_shape=jax.ShapeDtypeStruct((R, H), jnp.bfloat16),
        grid=(R // tile_r,),
        in_specs=[pl.BlockSpec((tile_r, H2), lambda i: (i, 0)),
                  pl.BlockSpec((H2, H), lambda i: (0, 0)),
                  pl.BlockSpec((1, H), lambda i: (0, 0))],
        out_specs=pl.BlockSpec((tile_r, H), lambda i: (i, 0)),
        compiler_params=pltpu.CompilerParams(
            dimension_semantics=("parallel",),
            vmem_limit_bytes=32 * 1024 * 1024),
    )(h_bf.reshape(R, H2), params["wa_h_t"], params["ba"])
    return eh2d.reshape(B, L, H)


# ----------------------------------------------------------------------------
# Kernel 1: one fused decoder step
#   embedding gather (async HBM row DMAs) + additive attention + single-step
#   GRU + output (fc) projection.  Token ids arrive via scalar prefetch (SMEM).
# ----------------------------------------------------------------------------
def decoder_step_kernel(tok_ref,                         # SMEM [B] int32 (scalar prefetch)
                        s_ref, h_ref, eh_ref, emb_hbm,   # [B,H] f32, [B,L,2H] bf16, [B,L,H] bf16, HBM [V,E] f32
                        wa_s_ref, v_ref,                 # [H,H] bf16, [1,H] f32
                        w_ih_e_ref, w_ih_c_ref, b_ih_ref,  # [3,E,H] bf16, [3,2H,H] bf16, [3,1,H] f32
                        w_hh_ref, b_hh_ref,              # [3,H,H] bf16, [3,1,H] f32
                        w_fc_ref, b_fc_ref,              # [H,V] bf16, [1,V] f32
                        logits_ref, s_out_ref,           # [B,V] f32, [B,H] f32
                        emb_sc, emb_sem):                # VMEM [B,E] f32, DMA sems (B,)
    f32 = jnp.float32
    bf16 = jnp.bfloat16
    B, H = s_ref.shape

    # ---- kick off the embedding row gather (HBM -> VMEM) up front ----------
    # The B row DMAs run underneath the attention compute (which does not
    # depend on the embedding), hiding the gather latency. The [V,E] table is
    # never made VMEM-resident.
    for b in range(B):                                   # B static & small -> unrolled
        t = tok_ref[b]
        pltpu.make_async_copy(emb_hbm.at[pl.ds(t, 1), :],
                              emb_sc.at[pl.ds(b, 1), :],
                              emb_sem.at[b]).start()
    # nn.Dropout(0.9) -> identity in eval/inference mode.
    # TODO(synk): training-mode stochastic dropout mask intentionally omitted.

    s = s_ref[...]                                       # [B, H] f32
    s_bf = s.astype(bf16)

    # ---- additive attention: energies from precomputed bf16 e_h + W_s s ----
    e_s = jnp.dot(s_bf, wa_s_ref[...], preferred_element_type=f32)      # [B, H] f32
    energy = jnp.tanh(eh_ref[...] + e_s[:, None, :])                    # bf16+f32 -> f32, [B, L, H]
    score = jnp.sum(energy * v_ref[...][None], axis=-1)                 # [B, L] (lane reduce)
    score = score - jnp.max(score, axis=-1, keepdims=True)
    p = jnp.exp(score)
    a = p * pl.reciprocal(jnp.sum(p, axis=-1, keepdims=True), approx=True)

    # ---- context c = bmm(a.unsqueeze(1), h) as a batched MXU dot -----------
    c = jnp.einsum("bql,blk->bqk", a[:, None, :].astype(bf16), h_ref[...],
                   preferred_element_type=f32)[:, 0, :]                 # [B, 2H] f32
    c_bf = c.astype(bf16)

    # ---- wait for the gathered embedding rows --------------------------------
    for b in range(B):
        pltpu.make_async_copy(emb_hbm.at[pl.ds(0, 1), :],
                              emb_sc.at[pl.ds(b, 1), :],
                              emb_sem.at[b]).wait()
    emb_bf = emb_sc[...].astype(bf16)                                   # [B, E]

    # ---- single-step GRU ------------------------------------------------------
    # Gate weights are stacked along a leading (r, z, n) axis so no activation
    # slice starts at a non-128-lane-aligned offset (H=32).  At production
    # (H a multiple of 128) a fused [*, 3H] layout works equally well.
    def gates(g):
        gi = (jnp.dot(emb_bf, w_ih_e_ref[g], preferred_element_type=f32)
              + jnp.dot(c_bf, w_ih_c_ref[g], preferred_element_type=f32)
              + b_ih_ref[g])
        gh = jnp.dot(s_bf, w_hh_ref[g], preferred_element_type=f32) + b_hh_ref[g]
        return gi, gh

    gi_r, gh_r = gates(0)
    gi_z, gh_z = gates(1)
    gi_n, gh_n = gates(2)
    r = jax.nn.sigmoid(gi_r + gh_r)
    z = jax.nn.sigmoid(gi_z + gh_z)
    n = jnp.tanh(gi_n + r * gh_n)
    s_new = (1.0 - z) * n + z * s                                       # [B, H] f32
    s_out_ref[...] = s_new

    # ---- fused output (fc) projection: lane-dense [B, V] logits -------------
    logits_ref[...] = (jnp.dot(s_new.astype(bf16), w_fc_ref[...],
                               preferred_element_type=f32)
                       + b_fc_ref[...])


# ----------------------------------------------------------------------------
# Wrapper
# ----------------------------------------------------------------------------
def decoder_forward(tok, s, h_bf, e_h, params):
    B = tok.shape[0]
    H = s.shape[-1]
    E = params["emb_tbl"].shape[1]
    V = params["w_fc_t"].shape[1]

    vmem = pl.BlockSpec(memory_space=pltpu.MemorySpace.VMEM)
    hbm = pl.BlockSpec(memory_space=pl.ANY)
    s2d = s.reshape(B, H).astype(jnp.float32)

    step_args = (s2d, h_bf, e_h, params["emb_tbl"],
                 params["wa_s_t"], params["v"],
                 params["w_ih_e3"], params["w_ih_c3"], params["b_ih3"],
                 params["w_hh3"], params["b_hh3"],
                 params["w_fc_t"], params["b_fc"])
    in_specs = [vmem, vmem, vmem, hbm] + [vmem] * 9

    logits, s_new = pl.pallas_call(
        decoder_step_kernel,
        out_shape=(jax.ShapeDtypeStruct((B, V), jnp.float32),
                   jax.ShapeDtypeStruct((B, H), jnp.float32)),
        grid_spec=pltpu.PrefetchScalarGridSpec(
            num_scalar_prefetch=1,                     # token ids -> SMEM
            grid=(1,),
            in_specs=in_specs,
            out_specs=[vmem, vmem],
            scratch_shapes=[pltpu.VMEM((B, E), jnp.float32),
                            pltpu.SemaphoreType.DMA((B,))],
        ),
        compiler_params=pltpu.CompilerParams(
            dimension_semantics=("arbitrary",),
            vmem_limit_bytes=32 * 1024 * 1024),
    )(tok.astype(jnp.int32), *step_args)

    # Match PyTorch return convention: (decoder_output [B,V], s -> [B,1,H])
    return logits, s_new.reshape(B, 1, H)


# ----------------------------------------------------------------------------
# Deterministic synthetic parameters (PyTorch shapes, repackaged for the kernel).
# ----------------------------------------------------------------------------
def init_params(key, V, E, H):
    ks = jax.random.split(key, 10)

    def rnd(k, shape, scale=0.1):
        return jax.random.normal(k, shape, jnp.float32) * scale

    emb_tbl = rnd(ks[0], (V, E), 1.0)            # nn.Embedding(V, E).weight
    attn_w = rnd(ks[1], (H, 3 * H))              # attention Linear(3H -> H).weight
    attn_b = rnd(ks[2], (H,))                    # attention Linear bias
    attn_v = rnd(ks[3], (1, H))                  # attention v: Linear(H -> 1, bias=False)
    w_ih = rnd(ks[4], (3 * H, E + 2 * H))        # GRU weight_ih_l0 (gates r,z,n)
    w_hh = rnd(ks[5], (3 * H, H))                # GRU weight_hh_l0
    b_ih = rnd(ks[6], (3 * H,))
    b_hh = rnd(ks[7], (3 * H,))
    w_fc = rnd(ks[8], (V, H))                    # fc.weight
    b_fc = rnd(ks[9], (V,))                      # fc.bias

    bf16 = jnp.bfloat16
    w_ih_t = w_ih.T                              # [E+2H, 3H], gate columns r,z,n
    w_hh_t = w_hh.T                              # [H, 3H]
    w_ih_e3 = jnp.stack([w_ih_t[:E, g * H:(g + 1) * H] for g in range(3)]).astype(bf16)   # [3, E, H]
    w_ih_c3 = jnp.stack([w_ih_t[E:, g * H:(g + 1) * H] for g in range(3)]).astype(bf16)   # [3, 2H, H]
    w_hh3 = jnp.stack([w_hh_t[:, g * H:(g + 1) * H] for g in range(3)]).astype(bf16)      # [3, H, H]
    return dict(
        emb_tbl=emb_tbl,                               # f32 [V,E]  (stays in HBM; row DMAs)
        wa_s_t=attn_w[:, :H].T.astype(bf16),           # [H, H]
        wa_h_t=attn_w[:, H:].T.astype(bf16),           # [2H, H]
        ba=attn_b.reshape(1, H),                       # f32 [1, H]
        v=attn_v,                                      # f32 [1, H]
        w_ih_e3=w_ih_e3,                               # bf16 [3, E, H]
        w_ih_c3=w_ih_c3,                               # bf16 [3, 2H, H]
        b_ih3=b_ih.reshape(3, 1, H),                   # f32
        w_hh3=w_hh3,                                   # bf16 [3, H, H]
        b_hh3=b_hh.reshape(3, 1, H),                   # f32
        w_fc_t=w_fc.T.astype(bf16),                    # [H, V]
        b_fc=b_fc.reshape(1, V),                       # f32
    )


# Pure-JAX reference (same bf16-rounded weights / bf16 e_h storage, f32 math).
def decoder_ref(tok, s, h_bf, p):
    f32 = jnp.float32
    H = s.shape[-1]
    h_f = h_bf.astype(f32)
    emb = jnp.take(p["emb_tbl"], tok, axis=0)                           # [B, E]
    s2 = s[:, 0, :]                                                     # [B, H]
    eh = jnp.einsum("blk,kh->blh", h_f, p["wa_h_t"].astype(f32)) + p["ba"][None]
    eh = eh.astype(jnp.bfloat16).astype(f32)                            # mirrors bf16 e_h storage
    es = s2 @ p["wa_s_t"].astype(f32)
    energy = jnp.tanh(eh + es[:, None, :])
    score = jnp.sum(energy * p["v"][None], axis=-1)
    a = jax.nn.softmax(score, axis=-1)
    c = jnp.einsum("bl,blk->bk", a, h_f)

    def gate(g):
        gi = (emb @ p["w_ih_e3"][g].astype(f32)
              + c @ p["w_ih_c3"][g].astype(f32) + p["b_ih3"][g])
        gh = s2 @ p["w_hh3"][g].astype(f32) + p["b_hh3"][g]
        return gi, gh

    gi_r, gh_r = gate(0)
    gi_z, gh_z = gate(1)
    gi_n, gh_n = gate(2)
    r = jax.nn.sigmoid(gi_r + gh_r)
    z = jax.nn.sigmoid(gi_z + gh_z)
    n = jnp.tanh(gi_n + r * gh_n)
    s_new = (1.0 - z) * n + z * s2
    logits = s_new @ p["w_fc_t"].astype(f32) + p["b_fc"]
    return logits, s_new[:, None, :]


if __name__ == "__main__":
    # Sublane-full / lane-dense demo shapes: B=8 fills sublanes, V=256 gives an
    # unmasked lane-dense logits store.
    B, L = 8, 8            # batch, source sequence length
    V, E, H = 256, 32, 32  # vocab_size, emb_size, hid_size

    key = jax.random.PRNGKey(0)
    k_tok, k_s, k_h, k_p = jax.random.split(key, 4)

    tok = jax.random.randint(k_tok, (B,), 0, V, dtype=jnp.int32)       # decoder_input
    s = jax.random.normal(k_s, (B, 1, H), jnp.float32)                 # decoder hidden
    h = jax.random.normal(k_h, (B, L, 2 * H), jnp.float32)             # encoder outputs
    params = init_params(k_p, V, E, H)

    h_bf = h.astype(jnp.bfloat16)                  # cast encoder outputs once
    e_h = precompute_attention_keys(h_bf, params)  # once per source sequence (bf16)
    logits, s_new = decoder_forward(tok, s, h_bf, e_h, params)
    jax.block_until_ready((logits, s_new))

    ref_logits, ref_s = decoder_ref(tok, s, h_bf, params)
    assert logits.shape == (B, V) and s_new.shape == (B, 1, H)
    # bf16 weights/activations on the MXU + approx softmax reciprocal -> 1e-2 tol.
    assert jnp.allclose(logits, ref_logits, rtol=1e-2, atol=1e-2)
    assert jnp.allclose(s_new, ref_s, rtol=1e-2, atol=1e-2)

    print("KERNEL_OK")
</pallas_src>

<mosaic_0001>
module attributes {stable_mosaic.version = 11 : i64} {
  func.func @attn_keys_kernel(%arg0: i32, %arg1: memref<64x64xbf16, #tpu.memory_space<vmem>>, %arg2: memref<64x32xbf16, #tpu.memory_space<vmem>>, %arg3: memref<1x32xf32, #tpu.memory_space<vmem>>, %arg4: memref<64x32xbf16, #tpu.memory_space<vmem>>) attributes {dimension_semantics = [#tpu.dimension_semantics<parallel>], iteration_bounds = array<i64: 1>, scalar_prefetch = 0 : i64, scratch_operands = 0 : i64, tpu.core_type = #tpu.core_type<tc>, window_params = [{transform_indices = @transform_0, window_bounds = array<i64: 64, 64>}, {pipeline_mode = #tpu.pipeline_mode<synchronous>, transform_indices = @transform_1, window_bounds = array<i64: 64, 32>}, {pipeline_mode = #tpu.pipeline_mode<synchronous>, transform_indices = @transform_2, window_bounds = array<i64: 1, 32>}, {transform_indices = @transform_3, window_bounds = array<i64: 64, 32>}]} {
    %c0 = arith.constant 0 : index
    %c0_0 = arith.constant 0 : index
    %0 = vector.load %arg1[%c0, %c0_0] : memref<64x64xbf16, #tpu.memory_space<vmem>>, vector<64x64xbf16>
    %c0_1 = arith.constant 0 : index
    %c0_2 = arith.constant 0 : index
    %1 = vector.load %arg2[%c0_1, %c0_2] : memref<64x32xbf16, #tpu.memory_space<vmem>>, vector<64x32xbf16>
    %cst = arith.constant dense<0.000000e+00> : vector<64x32xf32>
    %2 = tpu.matmul %0, %1, %cst {dimension_numbers = #tpu.dot_dimension_numbers<[1], [0], [0], [1], [0, 0, 1, 1], [], []>} : vector<64x64xbf16>, vector<64x32xbf16>, vector<64x32xf32> -> vector<64x32xf32>
    %c0_3 = arith.constant 0 : index
    %c0_4 = arith.constant 0 : index
    %3 = vector.load %arg3[%c0_3, %c0_4] : memref<1x32xf32, #tpu.memory_space<vmem>>, vector<1x32xf32>
    %4 = vector.broadcast %3 : vector<1x32xf32> to vector<64x32xf32>
    %5 = arith.addf %2, %4 : vector<64x32xf32>
    %6 = arith.truncf %5 : vector<64x32xf32> to vector<64x32xbf16>
    %c0_5 = arith.constant 0 : index
    %c0_6 = arith.constant 0 : index
    %7 = vector.load %arg4[%c0_5, %c0_6] : memref<64x32xbf16, #tpu.memory_space<vmem>>, vector<64x32xbf16>
    tpu.vector_store %arg4[%c0_5, %c0_6], %6 {strides = array<i32>} : memref<64x32xbf16, #tpu.memory_space<vmem>>, vector<64x32xbf16>,
    return
  }
  func.func @transform_0(%arg0: i32) -> (i32, i32) {
    %c0_i32 = arith.constant 0 : i32
    %c0_i32_0 = arith.constant 0 : i32
    return %arg0, %c0_i32 : i32, i32
  }
  func.func @transform_1(%arg0: i32) -> (i32, i32) {
    %c0_i32 = arith.constant 0 : i32
    %c0_i32_0 = arith.constant 0 : i32
    %c0_i32_1 = arith.constant 0 : i32
    return %c0_i32, %c0_i32_0 : i32, i32
  }
  func.func @transform_2(%arg0: i32) -> (i32, i32) {
    %c0_i32 = arith.constant 0 : i32
    %c0_i32_0 = arith.constant 0 : i32
    %c0_i32_1 = arith.constant 0 : i32
    return %c0_i32, %c0_i32_0 : i32, i32
  }
  func.func @transform_3(%arg0: i32) -> (i32, i32) {
    %c0_i32 = arith.constant 0 : i32
    %c0_i32_0 = arith.constant 0 : i32
    return %arg0, %c0_i32 : i32, i32
  }
}

</mosaic_0001>

<bundles_post_ra>
// kernel: tpu_custom_call.1
= control target key start
LH: loop header
LB: loop body
LE: loop exit
PB: predicated region body
PF: predicated region fallthrough
CT: control target
= control target key end

     0   :  { %vm79_vm0 = vcmask 523264   ;;  %vm129_vm1 = vcmask 257024   ;;  %s278_s1 = inlined_call_operand.vmem [shape: bf16[64,32], index: 1, kind: input, shape index: {}]   ;;  %s279_s2 = inlined_call_operand.vmem [shape: f32[1,32], index: 2, kind: input, shape index: {}]   ;;  %s280_s0 = inlined_call_operand.vmem [shape: bf16[64,64], index: 0, kind: input, shape index: {}]   ;;  %s281_s3 = inlined_call_operand.vmem [shape: bf16[64,32], index: 3, kind: output, shape index: {}]  }
   0x1   :  { %v185_v0 = vld [vmem:[%s278_s1 + $0x18] sm:$0xff]  ;;  %v184_v1 = vld [vmem:[%s278_s1 + $0x10] sm:$0xff]  ;;  %v183_v2 = vld [vmem:[%s278_s1 + $0x8] sm:$0xff] }
   0x2   :  { %96 = vmatpush.bf16.msra.mxu0 %v185_v0  ;;  %186 = vmatpush.bf16.msra.mxu1 %v185_v0  ;;  %v182_v3 = vld [vmem:[%s278_s1] sm:$0xff]  ;;  %v179_v5 = vld [vmem:[%s280_s0 + $0x8] sm:$0xff]  ;;  %v180_v6 = vld [vmem:[%s280_s0 + $0x10] sm:$0xff] }
   0x3   :  { %187 = vmatpush.bf16.msra.mxu2 %v185_v0  ;;  %188 = vmatpush.bf16.msra.mxu3 %v185_v0  ;;  %v178_v4 = vld [vmem:[%s280_s0] sm:$0xff]  ;;  %v181_v7 = vld [vmem:[%s280_s0 + $0x18] sm:$0xff] }
   0x4   :  { %v198_v8 = vld [vmem:[%s279_s2] ss:$0 sm:$0xff] }
   0x6   :  { %97 = vmatpush.bf16.msra.mxu0 %v184_v1  ;;  %189 = vmatpush.bf16.msra.mxu1 %v184_v1 }
   0x7   :  { %190 = vmatpush.bf16.msra.mxu2 %v184_v1  ;;  %191 = vmatpush.bf16.msra.mxu3 %v184_v1 }
   0xa   :  { %98 = vmatpush.bf16.msra.mxu0 %v183_v2  ;;  %192 = vmatpush.bf16.msra.mxu1 %v183_v2 }
   0xb   :  { %193 = vmatpush.bf16.msra.mxu2 %v183_v2  ;;  %194 = vmatpush.bf16.msra.mxu3 %v183_v2 }
   0xe   :  { %99 = vmatpush.bf16.msra.mxu0 %v182_v3  ;;  %195 = vmatpush.bf16.msra.mxu1 %v182_v3 }
   0xf   :  { %196 = vmatpush.bf16.msra.mxu2 %v182_v3  ;;  %197 = vmatpush.bf16.msra.mxu3 %v182_v3 }
  0x11   :  { %174 = vmatmul.msk.bf16.vlgmr.msra.gmra.mxu0 %vm79_vm0, %v178_v4  ;;  %175 = vmatmul.msk.bf16.vlgmr.msra.gmra.mxu1 %vm79_vm0, %v179_v5 }
  0x12   :  { %176 = vmatmul.msk.bf16.vlgmr.msra.gmra.mxu2 %vm79_vm0, %v180_v6  ;;  %177 = vmatmul.msk.bf16.vlgmr.msra.gmra.mxu3 %vm79_vm0, %v181_v7 }
  0x8e   :  { %v101_v9 = vpop.f32.mrf.mxu0  ;;  %v106_v10 = vpop.f32.mrf.mxu1 }
  0x8f   :  { %v102_v11 = vadd.f32 %v198_v8, %v101_v9  ;;  %v107_v12 = vadd.f32 %v198_v8, %v106_v10 }
  0x91   :  { %v121_v13 = vpack.c.bf16 %v102_v11, %v102_v11  ;;  %v123_v14 = vpack.c.bf16 %v107_v12, %v107_v12 }
  0x93   :  { %130 = vst.msk [vmem:[%s281_s3] sm:$0xf] %vm129_vm1, %v121_v13 }
  0x94   :  { %132 = vst.msk [vmem:[%s281_s3 + $0x8] sm:$0xf] %vm129_vm1, %v123_v14 }
  0x95   :  { %v111_v15 = vpop.f32.mrf.mxu2  ;;  %v116_v16 = vpop.f32.mrf.mxu3 }
  0x96   :  { %v112_v17 = vadd.f32 %v198_v8, %v111_v15  ;;  %v117_v18 = vadd.f32 %v198_v8, %v116_v16  ;;  %v103_v19 = vpop.f32.mrf.mxu0  ;;  %v108_v20 = vpop.f32.mrf.mxu1 }
  0x97   :  { %v104_v21 = vadd.f32 %v198_v8, %v103_v19  ;;  %v109_v22 = vadd.f32 %v198_v8, %v108_v20 }
  0x98   :  { %v125_v23 = vpack.c.bf16 %v112_v17, %v112_v17  ;;  %v127_v24 = vpack.c.bf16 %v117_v18, %v117_v18 }
  0x99   :  { %v122_v25 = vpack.c.bf16 %v104_v21, %v104_v21  ;;  %v124_v26 = vpack.c.bf16 %v109_v22, %v109_v22 }
  0x9a   :  { %134 = vst.msk [vmem:[%s281_s3 + $0x10] sm:$0xf] %vm129_vm1, %v125_v23 }
  0x9b   :  { %136 = vst.msk [vmem:[%s281_s3 + $0x18] sm:$0xf] %vm129_vm1, %v127_v24 }
  0x9c   :  { %131 = vst.msk [vmem:[%s281_s3 + $0x4] sm:$0xf] %vm129_vm1, %v122_v25 }
  0x9d   :  { %133 = vst.msk [vmem:[%s281_s3 + $0xc] sm:$0xf] %vm129_vm1, %v124_v26  ;;  %v113_v27 = vpop.f32.mrf.mxu2  ;;  %v118_v28 = vpop.f32.mrf.mxu3 }
  0x9e   :  { %v114_v29 = vadd.f32 %v198_v8, %v113_v27  ;;  %v119_v30 = vadd.f32 %v198_v8, %v118_v28 }
  0xa0   :  { %v126_v31 = vpack.c.bf16 %v114_v29, %v114_v29  ;;  %v128_v32 = vpack.c.bf16 %v119_v30, %v119_v30 }
  0xa2   :  { %135 = vst.msk [vmem:[%s281_s3 + $0x14] sm:$0xf] %vm129_vm1, %v126_v31 }
  0xa3   :  { %137 = vst.msk [vmem:[%s281_s3 + $0x1c] sm:$0xf] %vm129_vm1, %v128_v32 }

</bundles_post_ra>
